<compile_context>
chip_gen: v6e
topology: v6e:2x2x1
jax: 0.10.0
libtpu: 0.0.40
codegen_flags: <defaults>
</compile_context>

<pallas_src>
import functools

import jax
import jax.numpy as jnp
from jax.experimental import pallas as pl
from jax.experimental.pallas import tpu as pltpu

LANE = 128        # lane width (last dim)
MAX_TROW = 2048   # max sublane rows per grid step (1 MiB f32 per input block)


def _cdiv(a, b):
    return -(-a // b)


def _round_up(a, b):
    return _cdiv(a, b) * b


def _focal_loss_kernel(x_ref, t_ref, o_ref, *, alpha, gamma, tile_elems,
                       first_masked, rem, has_pad, trow):
    c = pl.program_id(0)   # megacore split axis ("parallel")
    i = pl.program_id(1)   # streaming/reduction axis ("arbitrary")

    @pl.when(i == 0)
    def _init():
        o_ref[...] = jnp.zeros_like(o_ref)

    # Native-dtype load, upcast to f32 for the math.
    x = x_ref[...].astype(jnp.float32)
    t = t_ref[...].astype(jnp.float32)

    # Numerically-stable binary_cross_entropy_with_logits (reduction='none'):
    #   bce = max(x, 0) - x*t + log(1 + exp(-|x|))
    bce = jnp.maximum(x, 0.0) - x * t + jnp.log1p(jnp.exp(-jnp.abs(x)))
    p_t = jnp.exp(-bce)
    w = 1.0 - p_t

    # (1 - p_t) ** gamma : explicit VPU multiplies for small integer gamma,
    # pow (EUP exp/log) only for non-integer gamma.
    if float(gamma).is_integer() and 0.0 <= float(gamma) <= 8.0:
        g = int(gamma)
        if g == 0:
            focal = jnp.ones_like(w)
        else:
            focal = w
            for _ in range(g - 1):
                focal = focal * w
    else:
        focal = w ** gamma

    loss = alpha * focal * bce

    def accum(vals):
        # Per-step reduction onto the resident (8, LANE) output block:
        # vreg-wise VPU adds only; the final cross-lane reduction is done in the wrapper.
        o_ref[...] += vals.reshape(trow // 8, 8, LANE).sum(axis=0)

    if has_pad:
        gstep = c * pl.num_programs(1) + i

        if first_masked > 0:
            @pl.when(gstep < first_masked)
            def _clean():
                accum(loss)

        @pl.when(gstep >= first_masked)
        def _masked():
            # Only the trailing tile(s) that overlap padding pay for the mask.
            row = jax.lax.broadcasted_iota(jnp.int32, (trow, LANE), 0)
            lane = jax.lax.broadcasted_iota(jnp.int32, (trow, LANE), 1)
            idx = row * LANE + lane                     # in-tile index, < tile_elems (int32-safe)
            valid = rem - (gstep - first_masked) * tile_elems
            accum(jnp.where(idx < valid, loss, 0.0))
    else:
        accum(loss)


def focal_loss(inputs, targets, alpha=0.25, gamma=2.0, reduction="mean"):
    x = inputs.reshape(-1)
    t = targets.reshape(-1)
    if not jnp.issubdtype(x.dtype, jnp.floating):
        x = x.astype(jnp.float32)
    if not jnp.issubdtype(t.dtype, jnp.floating):
        t = t.astype(jnp.float32)
    n = x.shape[0]

    # Tile selection: steps-first so padding waste stays < one tile; trow multiple of 16
    # (legal sublane multiple for both f32 and bf16 blocks).
    rows_needed = _cdiv(n, LANE)
    steps = _cdiv(rows_needed, MAX_TROW)
    ncs = 2 if steps >= 2 else 1          # megacore split only when there are multiple tiles
    if ncs == 2 and steps % 2:
        steps += 1
    trow = max(16, _round_up(_cdiv(rows_needed, steps), 16))
    padded_rows = steps * trow
    total = padded_rows * LANE
    pad = total - n

    tile_elems = trow * LANE
    first_masked = n // tile_elems                # first tile that contains any padding
    rem = n - first_masked * tile_elems           # valid elements in that tile (static, < tile_elems)

    if pad:
        # TODO(synk): for very large misaligned inputs, stream the aligned prefix directly and
        # handle the small tail separately instead of this full-array pad copy.
        x = jnp.pad(x, (0, pad))
        t = jnp.pad(t, (0, pad))
    x2 = x.reshape(padded_rows, LANE)
    t2 = t.reshape(padded_rows, LANE)

    half = steps // ncs
    grid = (ncs, half)

    kernel = functools.partial(
        _focal_loss_kernel,
        alpha=float(alpha), gamma=float(gamma), tile_elems=tile_elems,
        first_masked=first_masked, rem=rem, has_pad=bool(pad), trow=trow,
    )

    def in_map(c, i):
        return (c * half + i, 0)

    tile_spec = pl.BlockSpec((trow, LANE), in_map)

    partials = pl.pallas_call(
        kernel,
        out_shape=jax.ShapeDtypeStruct((ncs * 8, LANE), jnp.float32),
        grid_spec=pltpu.PrefetchScalarGridSpec(
            num_scalar_prefetch=0,
            grid=grid,
            in_specs=[tile_spec, tile_spec],
            out_specs=pl.BlockSpec((8, LANE), lambda c, i: (c, 0)),
        ),
        compiler_params=pltpu.CompilerParams(
            dimension_semantics=("parallel", "arbitrary"),
            vmem_limit_bytes=32 * 1024 * 1024,
        ),
    )(x2, t2)

    total_loss = jnp.sum(partials)
    if reduction == "mean":
        return total_loss / jnp.float32(n)
    return total_loss


def _focal_loss_ref(inputs, targets, alpha=0.25, gamma=2.0, reduction="mean"):
    x = inputs.astype(jnp.float32)
    t = targets.astype(jnp.float32)
    bce = jnp.maximum(x, 0.0) - x * t + jnp.log1p(jnp.exp(-jnp.abs(x)))
    p_t = jnp.exp(-bce)
    loss = alpha * (1.0 - p_t) ** gamma * bce
    return jnp.mean(loss) if reduction == "mean" else jnp.sum(loss)


if __name__ == "__main__":
    key = jax.random.PRNGKey(0)
    k1, k2 = jax.random.split(key)

    # NCHW inputs, binary targets (as expected by BCE-with-logits).
    inputs = jax.random.normal(k1, (2, 4, 16, 16), dtype=jnp.float32)
    targets = jax.random.bernoulli(k2, 0.5, (2, 4, 16, 16)).astype(jnp.float32)

    out = focal_loss(inputs, targets, alpha=0.25, gamma=2.0, reduction="mean")
    out = jax.block_until_ready(out)
    ref = _focal_loss_ref(inputs, targets, alpha=0.25, gamma=2.0, reduction="mean")
    assert jnp.allclose(out, ref, rtol=1e-5, atol=1e-6), (out, ref)

    # Non-aligned size: exercises the hoisted in-kernel padding mask.
    k3, k4 = jax.random.split(k2)
    x_odd = jax.random.normal(k3, (3, 5, 7, 11), dtype=jnp.float32)
    t_odd = jax.random.bernoulli(k4, 0.5, (3, 5, 7, 11)).astype(jnp.float32)
    out_odd = jax.block_until_ready(focal_loss(x_odd, t_odd))
    ref_odd = _focal_loss_ref(x_odd, t_odd)
    assert jnp.allclose(out_odd, ref_odd, rtol=1e-5, atol=1e-6), (out_odd, ref_odd)

    # bf16 inputs/targets: exercises native-dtype streaming with in-kernel upcast.
    x_bf = inputs.astype(jnp.bfloat16)
    t_bf = targets.astype(jnp.bfloat16)
    out_bf = jax.block_until_ready(focal_loss(x_bf, t_bf))
    ref_bf = _focal_loss_ref(x_bf, t_bf)
    assert jnp.allclose(out_bf, ref_bf, rtol=1e-5, atol=1e-6), (out_bf, ref_bf)

    print("KERNEL_OK")
</pallas_src>

<mosaic_0001>
module attributes {stable_mosaic.version = 11 : i64} {
  func.func @_focal_loss_kernel(%arg0: i32, %arg1: i32, %arg2: memref<16x128xf32, #tpu.memory_space<vmem>>, %arg3: memref<16x128xf32, #tpu.memory_space<vmem>>, %arg4: memref<8x128xf32, #tpu.memory_space<vmem>>) attributes {dimension_semantics = [#tpu.dimension_semantics<parallel>, #tpu.dimension_semantics<arbitrary>], iteration_bounds = array<i64: 1, 1>, scalar_prefetch = 0 : i64, scratch_operands = 0 : i64, tpu.core_type = #tpu.core_type<tc>, window_params = [{transform_indices = @transform_0, window_bounds = array<i64: 16, 128>}, {transform_indices = @transform_1, window_bounds = array<i64: 16, 128>}, {transform_indices = @transform_2, window_bounds = array<i64: 8, 128>}]} {
    %c0_i32 = arith.constant 0 : i32
    %0 = arith.cmpi eq, %arg1, %c0_i32 : i32
    %1 = arith.extui %0 : i1 to i32
    %c0_i32_0 = arith.constant 0 : i32
    %2 = arith.cmpi ne, %1, %c0_i32_0 : i32
    scf.if %2 {
      %cst_13 = arith.constant 0.000000e+00 : f32
      %29 = vector.broadcast %cst_13 : f32 to vector<8x128xf32>
      %c0_14 = arith.constant 0 : index
      %c0_15 = arith.constant 0 : index
      %30 = vector.load %arg4[%c0_14, %c0_15] : memref<8x128xf32, #tpu.memory_space<vmem>>, vector<8x128xf32>
      tpu.vector_store %arg4[%c0_14, %c0_15], %29 {strides = array<i32>} : memref<8x128xf32, #tpu.memory_space<vmem>>, vector<8x128xf32>,
    } else {
    }
    %c0 = arith.constant 0 : index
    %c0_1 = arith.constant 0 : index
    %3 = vector.load %arg2[%c0, %c0_1] : memref<16x128xf32, #tpu.memory_space<vmem>>, vector<16x128xf32>
    %c0_2 = arith.constant 0 : index
    %c0_3 = arith.constant 0 : index
    %4 = vector.load %arg3[%c0_2, %c0_3] : memref<16x128xf32, #tpu.memory_space<vmem>>, vector<16x128xf32>
    %cst = arith.constant 0.000000e+00 : f32
    %5 = vector.broadcast %cst : f32 to vector<16x128xf32>
    %6 = arith.maximumf %3, %5 : vector<16x128xf32>
    %7 = arith.mulf %3, %4 : vector<16x128xf32>
    %8 = arith.subf %6, %7 : vector<16x128xf32>
    %9 = math.absf %3 : vector<16x128xf32>
    %cst_4 = arith.constant 0.000000e+00 : f32
    %10 = vector.broadcast %cst_4 : f32 to vector<16x128xf32>
    %11 = arith.subf %10, %9 : vector<16x128xf32>
    %12 = math.exp %11 : vector<16x128xf32>
    %13 = math.log1p %12 : vector<16x128xf32>
    %14 = arith.addf %8, %13 : vector<16x128xf32>
    %cst_5 = arith.constant 0.000000e+00 : f32
    %15 = vector.broadcast %cst_5 : f32 to vector<16x128xf32>
    %16 = arith.subf %15, %14 : vector<16x128xf32>
    %17 = math.exp %16 : vector<16x128xf32>
    %cst_6 = arith.constant 1.000000e+00 : f32
    %18 = vector.broadcast %cst_6 : f32 to vector<16x128xf32>
    %19 = arith.subf %18, %17 : vector<16x128xf32>
    %20 = arith.mulf %19, %19 : vector<16x128xf32>
    %cst_7 = arith.constant 2.500000e-01 : f32
    %21 = vector.broadcast %cst_7 : f32 to vector<16x128xf32>
    %22 = arith.mulf %21, %20 : vector<16x128xf32>
    %23 = arith.mulf %22, %14 : vector<16x128xf32>
    %c0_8 = arith.constant 0 : index
    %c0_9 = arith.constant 0 : index
    %24 = vector.load %arg4[%c0_8, %c0_9] : memref<8x128xf32, #tpu.memory_space<vmem>>, vector<8x128xf32>
    %25 = vector.shape_cast %23 : vector<16x128xf32> to vector<2x8x128xf32>
    %cst_10 = arith.constant dense<0.000000e+00> : vector<8x128xf32>
    %26 = vector.multi_reduction <add>, %25, %cst_10 [0] : vector<2x8x128xf32> to vector<8x128xf32>
    %27 = arith.addf %24, %26 : vector<8x128xf32>
    %c0_11 = arith.constant 0 : index
    %c0_12 = arith.constant 0 : index
    %28 = vector.load %arg4[%c0_11, %c0_12] : memref<8x128xf32, #tpu.memory_space<vmem>>, vector<8x128xf32>
    tpu.vector_store %arg4[%c0_11, %c0_12], %27 {strides = array<i32>} : memref<8x128xf32, #tpu.memory_space<vmem>>, vector<8x128xf32>,
    return
  }
  func.func @transform_0(%arg0: i32, %arg1: i32) -> (i32, i32) {
    %c1_i32 = arith.constant 1 : i32
    %0 = arith.muli %arg0, %c1_i32 : i32
    %1 = arith.addi %0, %arg1 : i32
    %c0_i32 = arith.constant 0 : i32
    %c0_i32_0 = arith.constant 0 : i32
    return %1, %c0_i32 : i32, i32
  }
  func.func @transform_1(%arg0: i32, %arg1: i32) -> (i32, i32) {
    %c1_i32 = arith.constant 1 : i32
    %0 = arith.muli %arg0, %c1_i32 : i32
    %1 = arith.addi %0, %arg1 : i32
    %c0_i32 = arith.constant 0 : i32
    %c0_i32_0 = arith.constant 0 : i32
    return %1, %c0_i32 : i32, i32
  }
  func.func @transform_2(%arg0: i32, %arg1: i32) -> (i32, i32) {
    %c0_i32 = arith.constant 0 : i32
    %c0_i32_0 = arith.constant 0 : i32
    return %arg0, %c0_i32 : i32, i32
  }
}

</mosaic_0001>

<bundles_post_ra>
// kernel: tpu_custom_call.1
= control target key start
LH: loop header
LB: loop body
LE: loop exit
PB: predicated region body
PF: predicated region fallthrough
CT: control target
= control target key end

     0   :  { %7 = vsyncpa [#allocation3], 0  ;;  %s242_s0 = inlined_call_operand.hbm [shape: f32[16,128], index: 0, kind: input, shape index: {}]   ;;  %s243_s1 = inlined_call_operand.hbm [shape: f32[16,128], index: 1, kind: input, shape index: {}]   ;;  %s244_s2 = inlined_call_operand.hbm [shape: f32[8,128], index: 2, kind: output, shape index: {}]  }
   0x1   :  { %8 = vsyncpa [#allocation6], 0 }
   0x2   :  { %9 = vsyncpa [#allocation4], 0  ;;  %s213_s9 = smov [#allocation2]  }
   0x3   :  { %s19_s10 = sshll.u32 %s213_s9, 4  ;;  %s20_s10 = int_to_ptr.vmem [resolvable:$true] %s19_s10 }
   0x4   :  { %s155_s11 = scalar_lea.vmem %s20_s10, 256  ;;  %p160_p1 = scmp.lt.s32.totalorder %s20_s10, %s20_s10 }
   0x5   :  { %p156_p0 = scmp.ne.s32.totalorder %s20_s10, %s155_s11  ;;  %p161_p2 = scmp.lt.s32.totalorder %s155_s11, %s155_s11 }
   0x7   :  { %p162_p3 = por %p161_p2, %p160_p1 }
   0x9   :  { %p163_p4 = pnand %p162_p3, %p156_p0 }
   0xb   :  { %166 = shalt.err (!%p163_p4)
}
   0xc   :  { %s214_s12 = smov 128   ;;  %s215_s13 = smov 8  }
   0xd   :  { %25 = dma.hbm_to_vmem [thread:$0]  %s242_s0, 256, %s20_s10, [#allocation3], %s214_s12, %s214_s12, %s215_s13  }
   0xe   :  { %s216_s16 = smov [#allocation5]  }
   0xf   :  { %s35_s17 = sshll.u32 %s216_s16, 4  ;;  %s36_s17 = int_to_ptr.vmem [resolvable:$true] %s35_s17 }
  0x10   :  { %s175_s18 = scalar_lea.vmem %s36_s17, 256  ;;  %p180_p6 = scmp.lt.s32.totalorder %s36_s17, %s36_s17 }
  0x11   :  { %p176_p5 = scmp.ne.s32.totalorder %s36_s17, %s175_s18  ;;  %p181_p7 = scmp.lt.s32.totalorder %s175_s18, %s175_s18 }
  0x13   :  { %p182_p8 = por %p181_p7, %p180_p6 }
  0x15   :  { %p183_p9 = pnand %p182_p8, %p176_p5 }
  0x17   :  { %186 = shalt.err (!%p183_p9)
}
  0x18   :  { %41 = dma.hbm_to_vmem [thread:$0]  %s243_s1, 256, %s36_s17, [#allocation6], %s214_s12, %s214_s12, %s215_s13  }
  0x19   :  { %207 = dma.done.wait [#allocation3], 256  }
  0x1a   :  { %208 = vsyncadd [#allocation3], 4294967040 }
  0x1b   :  { %209 = dma.done.wait [#allocation6], 256  }
  0x1c   :  { %210 = vsyncadd [#allocation6], 4294967040  ;;  %v57_v0 = vld [vmem:[#allocation2] sm:$0xff]  ;;  %v58_v1 = vld [vmem:[#allocation2 + $0x8] sm:$0xff]  ;;  %s217_s0 = smov [#allocation7]  }
  0x1d   :  { %v67_v2 = vand.u32 2147483647, %v57_v0  ;;  %v68_v3 = vand.u32 2147483647, %v58_v1  ;;  %v59_v14 = vld [vmem:[#allocation5] sm:$0xff]  ;;  %v60_v15 = vld [vmem:[#allocation5 + $0x8] sm:$0xff] }
  0x1e   :  { %v61_v17 = vmax.f32 %v57_v0, 0.0  ;;  %v63_v18 = vmul.f32 %v59_v14, %v57_v0  ;;  %v62_v21 = vmax.f32 %v58_v1, 0.0  ;;  %v64_v22 = vmul.f32 %v60_v15, %v58_v1  ;;  %s119_s1 = sshll.u32 %s217_s0, 4  ;;  %s120_s1 = int_to_ptr.vmem [resolvable:$true] %s119_s1 }
  0x1f   :  { %v69_v4 = vsub.f32 0.0, %v67_v2  ;;  %v70_v5 = vsub.f32 0.0, %v68_v3  ;;  %s187_s21 = scalar_lea.vmem %s120_s1, 128  ;;  %p192_p11 = scmp.lt.s32.totalorder %s120_s1, %s120_s1 }
  0x20   :  { %v65_v26 = vsub.f32 %v61_v17, %v63_v18  ;;  %v66_v29 = vsub.f32 %v62_v21, %v64_v22  ;;  %p188_p10 = scmp.ne.s32.totalorder %s120_s1, %s187_s21  ;;  %p193_p12 = scmp.lt.s32.totalorder %s187_s21, %s187_s21 }
  0x21   :  { %v71_v6 = vmul.f32 1.442695, %v69_v4  ;;  %v73_v7 = vmul.f32 1.442695, %v70_v5 }
  0x22   :  { %p194_p13 = por %p193_p12, %p192_p11 }
  0x23   :  { %135 = vpow2.f32 %v71_v6 }
  0x24   :  { %137 = vpow2.f32 %v73_v7  ;;  %p195_p0 = pnand %p194_p13, %p188_p10 }
  0x30   :  { %v136_v8 = vpop.eup %135 }
  0x31   :  { %v138_v9 = vpop.eup %137  ;;  %v75_v10 = vadd.f32 1.0, %v136_v8  ;;  %v78_v12 = vmul.f32 -0.5, %v136_v8  ;;  %v81_v19 = vand.u32 2147483647, %v136_v8 }
  0x32   :  { %v84_v11 = vadd.f32 1.0, %v138_v9  ;;  %v87_v13 = vmul.f32 -0.5, %v138_v9  ;;  %v90_v23 = vand.u32 2147483647, %v138_v9 }
  0x33   :  { %139 = vlog2.f32 %v75_v10  ;;  %v79_v16 = vadd.f32 1.0, %v78_v12  ;;  %vm82_vm0 = vcmp.lt.f32.partialorder %v81_v19, 0.0004427343 }
  0x34   :  { %141 = vlog2.f32 %v84_v11  ;;  %v88_v20 = vadd.f32 1.0, %v87_v13  ;;  %vm91_vm1 = vcmp.lt.f32.partialorder %v90_v23, 0.0004427343 }
  0x35   :  { %v80_v24 = vmul.f32 %v136_v8, %v79_v16 }
  0x36   :  { %v89_v27 = vmul.f32 %v138_v9, %v88_v20 }
  0x40   :  { %v140_v25 = vpop.eup %139 }
  0x41   :  { %v142_v28 = vpop.eup %141  ;;  %v77_v30 = vmul.f32 0.6931472, %v140_v25 }
  0x42   :  { %v86_v31 = vmul.f32 0.6931472, %v142_v28 }
  0x43   :  { %v83_v32 = vsel %vm82_vm0, %v80_v24, %v77_v30 }
  0x44   :  { %v92_v33 = vsel %vm91_vm1, %v89_v27, %v86_v31  ;;  %v93_v34 = vadd.f32 %v83_v32, %v65_v26 }
  0x45   :  { %v94_v35 = vadd.f32 %v92_v33, %v66_v29 }
  0x46   :  { %v95_v36 = vsub.f32 0.0, %v93_v34 }
  0x47   :  { %v96_v37 = vsub.f32 0.0, %v94_v35 }
  0x48   :  { %v97_v38 = vmul.f32 1.442695, %v95_v36 }
  0x49   :  { %v99_v39 = vmul.f32 1.442695, %v96_v37 }
  0x4a   :  { %143 = vpow2.f32 %v97_v38 }
  0x4b   :  { %145 = vpow2.f32 %v99_v39 }
  0x57   :  { %v144_v40 = vpop.eup %143 }
  0x58   :  { %v146_v41 = vpop.eup %145  ;;  %v101_v42 = vsub.f32 1.0, %v144_v40 }
  0x59   :  { %v102_v43 = vsub.f32 1.0, %v146_v41 }
  0x5a   :  { %v103_v44 = vmul.f32 %v101_v42, %v101_v42 }
  0x5b   :  { %v104_v45 = vmul.f32 %v102_v43, %v102_v43 }
  0x5c   :  { %v105_v46 = vmul.f32 0.25, %v103_v44 }
  0x5d   :  { %v106_v47 = vmul.f32 0.25, %v104_v45 }
  0x5e   :  { %v107_v48 = vmul.f32 %v105_v46, %v93_v34 }
  0x5f   :  { %v108_v49 = vmul.f32 %v106_v47, %v94_v35 }
  0x61   :  { %v110_v50 = vadd.f32 %v108_v49, %v107_v48 }
  0x63   :  { %112 = vst [vmem:[#allocation7] sm:$0xff] %v110_v50 }
  0x64   :  { %198 = shalt.err (!%p195_p0)
}
  0x65   :  { %122 = dma.vmem_to_hbm [thread:$0]  %s120_s1, 128, %s244_s2, [#allocation4]  }
  0x66   :  { %211 = dma.done.wait [#allocation4], 128  }
  0x67   :  { %212 = vsyncadd [#allocation4], 4294967168 }
  0x68   :  { %126 = vsyncpa [#allocation3], 1 }
  0x69   :  { %127 = vsyncpa [#allocation6], 1 }
  0x6a   :  { %128 = vsyncpa [#allocation4], 1 }

</bundles_post_ra>
